<compile_context>
chip_gen: v5e
topology: v5e:2x2
jax: 0.10.0
libtpu: 0.0.40
codegen_flags: <defaults>
</compile_context>

<pallas_src>
import math

import jax
import jax.numpy as jnp
from jax.experimental import pallas as pl
from jax.experimental.pallas import tpu as pltpu


_SQRT2 = math.sqrt(2.0)  # plain Python float: traces as a literal, not a captured const


def _erfinv_f32(x):
    """Single-precision erfinv (Giles 2012 polynomial approximation).

    All coefficients are Python floats so nothing is captured as a jaxpr constant
    and weak-type promotion keeps everything in float32.
    """
    w = -jnp.log((1.0 - x) * (1.0 + x))

    # central branch (w < 5)
    wc = w - 2.5
    p1 = 2.81022636e-08 * wc + 3.43273939e-07
    p1 = p1 * wc + -3.5233877e-06
    p1 = p1 * wc + -4.39150654e-06
    p1 = p1 * wc + 0.00021858087
    p1 = p1 * wc + -0.00125372503
    p1 = p1 * wc + -0.00417768164
    p1 = p1 * wc + 0.246640727
    p1 = p1 * wc + 1.50140941

    # tail branch (w >= 5)
    wt = jnp.sqrt(jnp.maximum(w, 5.0)) - 3.0
    p2 = -0.000200214257 * wt + 0.000100950558
    p2 = p2 * wt + 0.00134934322
    p2 = p2 * wt + -0.00367342844
    p2 = p2 * wt + 0.00573950773
    p2 = p2 * wt + -0.0076224613
    p2 = p2 * wt + 0.00943887047
    p2 = p2 * wt + 1.00167406
    p2 = p2 * wt + 2.83297682

    p = jnp.where(w < 5.0, p1, p2)
    return p * x


def weibull_kernel(x_ref, wt_ref, b_ref, t_ref, out_ref):
    x = x_ref[...]                               # (tn, d)  f32
    wt = wt_ref[...]                             # (8, d)   rows 0/1 = w1/w2

    # (8, d) contracted with (tn, d) over d -> (8, tn).  This is the A @ B^T MXU
    # pattern; rows 0/1 give k/lambda already lane-dense (batch on the lane axis).
    kl = jax.lax.dot_general(
        wt, x, (((1,), (1,)), ((), ())),
        preferred_element_type=jnp.float32)      # (8, tn)

    k = kl[0:1, :] + b_ref[0]                    # (1, tn)
    lam = kl[1:2, :] + b_ref[1]                  # (1, tn)
    t = t_ref[...]                               # (1, tn), T > 0 assumed

    # T ** (k - 1) for T > 0  (matches torch.pow for a positive base).
    t_pow = jnp.exp((k - 1.0) * jnp.log(t))
    num = k * t_pow
    proba = num / (num + lam)

    f = _erfinv_f32(2.0 * proba - 1.0) * _SQRT2
    out_ref[...] = f.astype(out_ref.dtype)       # lane-dense (1, tn) store


def weibull_mechanism(x, t, w_fused, b_fused, *, tn=1024):
    """x: (N, d) f32, t: (N,) f32 (T > 0), w_fused: (d, 2), b_fused: (1, 2) -> (N, 1)."""
    n, d = x.shape
    x = jnp.asarray(x, jnp.float32)
    t = jnp.asarray(t, jnp.float32)

    # --- choose a lane-aligned row tile -------------------------------------
    tn = max(128, (int(tn) // 128) * 128)        # multiple of 128 (lane axis)
    if n < tn:
        tn = ((n + 127) // 128) * 128            # shrink for small batches
    # VMEM budget: double-buffered X tile (2 * tn * d * 4 B) must fit comfortably
    # in the default scoped VMEM on all generations (v7x: 64 MiB phys / 32 MiB scoped).
    max_tile_bytes = 8 * 1024 * 1024
    while tn > 128 and 2 * tn * d * 4 > max_tile_bytes:
        tn -= 128

    n_pad = ((n + tn - 1) // tn) * tn
    if n_pad != n:
        x = jnp.pad(x, ((0, n_pad - n), (0, 0)))                 # zero rows
        t = jnp.pad(t, ((0, n_pad - n),), constant_values=1.0)   # keep log(T) finite

    # Fused weights: (8, d) slab, rows 0/1 = w1^T / w2^T, rows 2..7 zero.
    w_t = jnp.zeros((8, d), jnp.float32).at[0:2, :].set(
        jnp.asarray(w_fused, jnp.float32).T)
    b = jnp.asarray(b_fused, jnp.float32).reshape(-1)            # (2,) -> SMEM scalars

    t_row = t.reshape(1, n_pad)

    grid = (n_pad // tn,)
    out = pl.pallas_call(
        weibull_kernel,
        out_shape=jax.ShapeDtypeStruct((1, n_pad), jnp.float32),
        grid_spec=pltpu.PrefetchScalarGridSpec(
            num_scalar_prefetch=0,
            grid=grid,
            in_specs=[
                pl.BlockSpec((tn, d), lambda i: (i, 0)),                 # X rows
                pl.BlockSpec((8, d), lambda i: (0, 0)),                  # fused W^T
                pl.BlockSpec(memory_space=pltpu.MemorySpace.SMEM),       # bias (2,)
                pl.BlockSpec((1, tn), lambda i: (0, i)),                 # T, lane-dense
            ],
            out_specs=pl.BlockSpec((1, tn), lambda i: (0, i)),           # lane-dense out
        ),
        compiler_params=pltpu.CompilerParams(
            dimension_semantics=("parallel",)),
        cost_estimate=pl.CostEstimate(
            flops=2 * 8 * d * n_pad + 60 * n_pad,
            transcendentals=5 * n_pad,
            bytes_accessed=n_pad * d * 4 + 2 * n_pad * 4 + 8 * d * 4),
    )(x, w_t, b, t_row)

    return out[0, :n].reshape(n, 1)


def _reference(x, t, w_fused, b_fused):
    kl = x @ w_fused + b_fused
    k = kl[:, 0]
    lam = kl[:, 1]
    t_pow = jnp.power(t, k - 1.0)
    proba = k * t_pow / (k * t_pow + lam)
    f = jax.scipy.special.erfinv(2.0 * proba - 1.0) * math.sqrt(2.0)
    return f[:, None]


if __name__ == "__main__":
    N, D = 500, 32   # non-multiple-of-128 batch exercises the padding/slicing path

    key = jax.random.PRNGKey(0)
    kx, kt, kw1, kw2 = jax.random.split(key, 4)

    # Deterministic synthetic parameters (torch.nn.Linear-style uniform scale,
    # biases pinned to 1.0 so proba stays in (0, 1) for this demo).
    bound = 1.0 / math.sqrt(D)
    w1 = jax.random.uniform(kw1, (D, 1), jnp.float32, -bound, bound)
    w2 = jax.random.uniform(kw2, (D, 1), jnp.float32, -bound, bound)
    w_fused = jnp.concatenate([w1, w2], axis=1)          # (D, 2)
    b_fused = jnp.ones((1, 2), jnp.float32)              # (1, 2)

    # Inputs
    x = 0.1 * jax.random.normal(kx, (N, D), jnp.float32)
    t = jax.random.uniform(kt, (N,), jnp.float32, 0.5, 1.5)   # survival times > 0

    # tn=256 here just to exercise a multi-step grid at demo scale;
    # real workloads should use the default tn=1024 (or larger, VMEM permitting).
    out = weibull_mechanism(x, t, w_fused, b_fused, tn=256)
    out = jax.block_until_ready(out)

    ref = _reference(x, t, w_fused, b_fused)
    assert out.shape == (N, 1)
    assert jnp.allclose(out, ref, atol=1e-3, rtol=1e-3), (out, ref)

    print("KERNEL_OK")
</pallas_src>

<mosaic_0001>
module attributes {stable_mosaic.version = 11 : i64} {
  func.func @weibull_kernel(%arg0: i32, %arg1: memref<256x32xf32, #tpu.memory_space<vmem>>, %arg2: memref<8x32xf32, #tpu.memory_space<vmem>>, %arg3: memref<2xf32, #tpu.memory_space<smem>>, %arg4: memref<1x256xf32, #tpu.memory_space<vmem>>, %arg5: memref<1x256xf32, #tpu.memory_space<vmem>>) attributes {dimension_semantics = [#tpu.dimension_semantics<parallel>], iteration_bounds = array<i64: 2>, scalar_prefetch = 0 : i64, scratch_operands = 0 : i64, tpu.core_type = #tpu.core_type<tc>, window_params = [{transform_indices = @transform_0, window_bounds = array<i64: 256, 32>}, {pipeline_mode = #tpu.pipeline_mode<synchronous>, transform_indices = @transform_1, window_bounds = array<i64: 8, 32>}, {transform_indices = @transform_2, window_bounds = array<i64: 2>}, {transform_indices = @transform_3, window_bounds = array<i64: 1, 256>}, {transform_indices = @transform_4, window_bounds = array<i64: 1, 256>}]} {
    %c0 = arith.constant 0 : index
    %c0_0 = arith.constant 0 : index
    %0 = vector.load %arg1[%c0, %c0_0] : memref<256x32xf32, #tpu.memory_space<vmem>>, vector<256x32xf32>
    %c0_1 = arith.constant 0 : index
    %c0_2 = arith.constant 0 : index
    %1 = vector.load %arg2[%c0_1, %c0_2] : memref<8x32xf32, #tpu.memory_space<vmem>>, vector<8x32xf32>
    %cst = arith.constant dense<0.000000e+00> : vector<8x256xf32>
    %2 = tpu.matmul %1, %0, %cst {dimension_numbers = #tpu.dot_dimension_numbers<[1], [1], [0], [0], [0, 0, 1, 0], [], []>} : vector<8x32xf32>, vector<256x32xf32>, vector<8x256xf32> -> vector<8x256xf32>
    %3 = vector.extract_strided_slice %2 {offsets = [0, 0], sizes = [1, 256], strides = [1, 1]} : vector<8x256xf32> to vector<1x256xf32>
    %c0_3 = arith.constant 0 : index
    %4 = memref.load %arg3[%c0_3] : memref<2xf32, #tpu.memory_space<smem>>
    %5 = vector.broadcast %4 : f32 to vector<1x256xf32>
    %6 = arith.addf %3, %5 : vector<1x256xf32>
    %7 = vector.extract_strided_slice %2 {offsets = [1, 0], sizes = [1, 256], strides = [1, 1]} : vector<8x256xf32> to vector<1x256xf32>
    %c1 = arith.constant 1 : index
    %8 = memref.load %arg3[%c1] : memref<2xf32, #tpu.memory_space<smem>>
    %9 = vector.broadcast %8 : f32 to vector<1x256xf32>
    %10 = arith.addf %7, %9 : vector<1x256xf32>
    %c0_4 = arith.constant 0 : index
    %c0_5 = arith.constant 0 : index
    %11 = vector.load %arg4[%c0_4, %c0_5] : memref<1x256xf32, #tpu.memory_space<vmem>>, vector<1x256xf32>
    %cst_6 = arith.constant 1.000000e+00 : f32
    %12 = vector.broadcast %cst_6 : f32 to vector<1x256xf32>
    %13 = arith.subf %6, %12 : vector<1x256xf32>
    %14 = math.log %11 : vector<1x256xf32>
    %15 = arith.mulf %13, %14 : vector<1x256xf32>
    %16 = math.exp %15 : vector<1x256xf32>
    %17 = arith.mulf %6, %16 : vector<1x256xf32>
    %18 = arith.addf %17, %10 : vector<1x256xf32>
    %19 = arith.divf %17, %18 : vector<1x256xf32>
    %cst_7 = arith.constant 2.000000e+00 : f32
    %20 = vector.broadcast %cst_7 : f32 to vector<1x256xf32>
    %21 = arith.mulf %20, %19 : vector<1x256xf32>
    %cst_8 = arith.constant 1.000000e+00 : f32
    %22 = vector.broadcast %cst_8 : f32 to vector<1x256xf32>
    %23 = arith.subf %21, %22 : vector<1x256xf32>
    %cst_9 = arith.constant 1.000000e+00 : f32
    %24 = vector.broadcast %cst_9 : f32 to vector<1x256xf32>
    %25 = arith.subf %24, %23 : vector<1x256xf32>
    %cst_10 = arith.constant 1.000000e+00 : f32
    %26 = vector.broadcast %cst_10 : f32 to vector<1x256xf32>
    %27 = arith.addf %26, %23 : vector<1x256xf32>
    %28 = arith.mulf %25, %27 : vector<1x256xf32>
    %29 = math.log %28 : vector<1x256xf32>
    %cst_11 = arith.constant 0.000000e+00 : f32
    %30 = vector.broadcast %cst_11 : f32 to vector<1x256xf32>
    %31 = arith.subf %30, %29 : vector<1x256xf32>
    %cst_12 = arith.constant 2.500000e+00 : f32
    %32 = vector.broadcast %cst_12 : f32 to vector<1x256xf32>
    %33 = arith.subf %31, %32 : vector<1x256xf32>
    %cst_13 = arith.constant 2.81022636E-8 : f32
    %34 = vector.broadcast %cst_13 : f32 to vector<1x256xf32>
    %35 = arith.mulf %34, %33 : vector<1x256xf32>
    %cst_14 = arith.constant 3.43273939E-7 : f32
    %36 = vector.broadcast %cst_14 : f32 to vector<1x256xf32>
    %37 = arith.addf %35, %36 : vector<1x256xf32>
    %38 = arith.mulf %37, %33 : vector<1x256xf32>
    %cst_15 = arith.constant -3.5233877E-6 : f32
    %39 = vector.broadcast %cst_15 : f32 to vector<1x256xf32>
    %40 = arith.addf %38, %39 : vector<1x256xf32>
    %41 = arith.mulf %40, %33 : vector<1x256xf32>
    %cst_16 = arith.constant -4.39150654E-6 : f32
    %42 = vector.broadcast %cst_16 : f32 to vector<1x256xf32>
    %43 = arith.addf %41, %42 : vector<1x256xf32>
    %44 = arith.mulf %43, %33 : vector<1x256xf32>
    %cst_17 = arith.constant 2.1858087E-4 : f32
    %45 = vector.broadcast %cst_17 : f32 to vector<1x256xf32>
    %46 = arith.addf %44, %45 : vector<1x256xf32>
    %47 = arith.mulf %46, %33 : vector<1x256xf32>
    %cst_18 = arith.constant -0.00125372503 : f32
    %48 = vector.broadcast %cst_18 : f32 to vector<1x256xf32>
    %49 = arith.addf %47, %48 : vector<1x256xf32>
    %50 = arith.mulf %49, %33 : vector<1x256xf32>
    %cst_19 = arith.constant -0.00417768164 : f32
    %51 = vector.broadcast %cst_19 : f32 to vector<1x256xf32>
    %52 = arith.addf %50, %51 : vector<1x256xf32>
    %53 = arith.mulf %52, %33 : vector<1x256xf32>
    %cst_20 = arith.constant 0.246640727 : f32
    %54 = vector.broadcast %cst_20 : f32 to vector<1x256xf32>
    %55 = arith.addf %53, %54 : vector<1x256xf32>
    %56 = arith.mulf %55, %33 : vector<1x256xf32>
    %cst_21 = arith.constant 1.50140941 : f32
    %57 = vector.broadcast %cst_21 : f32 to vector<1x256xf32>
    %58 = arith.addf %56, %57 : vector<1x256xf32>
    %cst_22 = arith.constant 5.000000e+00 : f32
    %59 = vector.broadcast %cst_22 : f32 to vector<1x256xf32>
    %60 = arith.maximumf %31, %59 : vector<1x256xf32>
    %61 = math.sqrt %60 : vector<1x256xf32>
    %cst_23 = arith.constant 3.000000e+00 : f32
    %62 = vector.broadcast %cst_23 : f32 to vector<1x256xf32>
    %63 = arith.subf %61, %62 : vector<1x256xf32>
    %cst_24 = arith.constant -2.00214257E-4 : f32
    %64 = vector.broadcast %cst_24 : f32 to vector<1x256xf32>
    %65 = arith.mulf %64, %63 : vector<1x256xf32>
    %cst_25 = arith.constant 1.00950558E-4 : f32
    %66 = vector.broadcast %cst_25 : f32 to vector<1x256xf32>
    %67 = arith.addf %65, %66 : vector<1x256xf32>
    %68 = arith.mulf %67, %63 : vector<1x256xf32>
    %cst_26 = arith.constant 0.00134934322 : f32
    %69 = vector.broadcast %cst_26 : f32 to vector<1x256xf32>
    %70 = arith.addf %68, %69 : vector<1x256xf32>
    %71 = arith.mulf %70, %63 : vector<1x256xf32>
    %cst_27 = arith.constant -0.00367342844 : f32
    %72 = vector.broadcast %cst_27 : f32 to vector<1x256xf32>
    %73 = arith.addf %71, %72 : vector<1x256xf32>
    %74 = arith.mulf %73, %63 : vector<1x256xf32>
    %cst_28 = arith.constant 0.00573950773 : f32
    %75 = vector.broadcast %cst_28 : f32 to vector<1x256xf32>
    %76 = arith.addf %74, %75 : vector<1x256xf32>
    %77 = arith.mulf %76, %63 : vector<1x256xf32>
    %cst_29 = arith.constant -0.0076224613 : f32
    %78 = vector.broadcast %cst_29 : f32 to vector<1x256xf32>
    %79 = arith.addf %77, %78 : vector<1x256xf32>
    %80 = arith.mulf %79, %63 : vector<1x256xf32>
    %cst_30 = arith.constant 0.00943887047 : f32
    %81 = vector.broadcast %cst_30 : f32 to vector<1x256xf32>
    %82 = arith.addf %80, %81 : vector<1x256xf32>
    %83 = arith.mulf %82, %63 : vector<1x256xf32>
    %cst_31 = arith.constant 1.00167406 : f32
    %84 = vector.broadcast %cst_31 : f32 to vector<1x256xf32>
    %85 = arith.addf %83, %84 : vector<1x256xf32>
    %86 = arith.mulf %85, %63 : vector<1x256xf32>
    %cst_32 = arith.constant 2.83297682 : f32
    %87 = vector.broadcast %cst_32 : f32 to vector<1x256xf32>
    %88 = arith.addf %86, %87 : vector<1x256xf32>
    %cst_33 = arith.constant 5.000000e+00 : f32
    %89 = vector.broadcast %cst_33 : f32 to vector<1x256xf32>
    %90 = arith.cmpf olt, %31, %89 : vector<1x256xf32>
    %91 = arith.select %90, %58, %88 : vector<1x256xi1>, vector<1x256xf32>
    %92 = arith.mulf %91, %23 : vector<1x256xf32>
    %cst_34 = arith.constant 1.41421354 : f32
    %93 = vector.broadcast %cst_34 : f32 to vector<1x256xf32>
    %94 = arith.mulf %92, %93 : vector<1x256xf32>
    %c0_35 = arith.constant 0 : index
    %c0_36 = arith.constant 0 : index
    %95 = vector.load %arg5[%c0_35, %c0_36] : memref<1x256xf32, #tpu.memory_space<vmem>>, vector<1x256xf32>
    tpu.vector_store %arg5[%c0_35, %c0_36], %94 {strides = array<i32>} : memref<1x256xf32, #tpu.memory_space<vmem>>, vector<1x256xf32>,
    return
  }
  func.func @transform_0(%arg0: i32) -> (i32, i32) {
    %c0_i32 = arith.constant 0 : i32
    %c0_i32_0 = arith.constant 0 : i32
    return %arg0, %c0_i32 : i32, i32
  }
  func.func @transform_1(%arg0: i32) -> (i32, i32) {
    %c0_i32 = arith.constant 0 : i32
    %c0_i32_0 = arith.constant 0 : i32
    %c0_i32_1 = arith.constant 0 : i32
    return %c0_i32, %c0_i32_0 : i32, i32
  }
  func.func @transform_2(%arg0: i32) -> i32 {
    %c0_i32 = arith.constant 0 : i32
    %c0_i32_0 = arith.constant 0 : i32
    return %c0_i32 : i32
  }
  func.func @transform_3(%arg0: i32) -> (i32, i32) {
    %c0_i32 = arith.constant 0 : i32
    %c0_i32_0 = arith.constant 0 : i32
    return %c0_i32, %arg0 : i32, i32
  }
  func.func @transform_4(%arg0: i32) -> (i32, i32) {
    %c0_i32 = arith.constant 0 : i32
    %c0_i32_0 = arith.constant 0 : i32
    return %c0_i32, %arg0 : i32, i32
  }
}

</mosaic_0001>

<bundles_post_ra>
// kernel: tpu_custom_call.1
= control target key start
LH: loop header
LB: loop body
LE: loop exit
PB: predicated region body
PF: predicated region fallthrough
CT: control target
= control target key end

     0   :  { %9 = vsyncpa [#allocation4], 0  ;;  %s1135_s0 = inlined_call_operand.vmem [shape: f32[512,32], index: 0, kind: input, shape index: {}]   ;;  %s1136_s1 = inlined_call_operand.vmem [shape: f32[8,32], index: 1, kind: input, shape index: {}]   ;;  %s1137_s2 = inlined_call_operand.vmem [shape: f32[2], index: 2, kind: input, shape index: {}]   ;;  %s1138_s3 = inlined_call_operand.vmem [shape: f32[1,512], index: 3, kind: input, shape index: {}]   ;;  %s1139_s4 = inlined_call_operand.hbm [shape: f32[1,512], index: 4, kind: output, shape index: {}]  }
   0x1   :  { %10 = vsyncpa [#allocation3], 0 }
   0x2   :  { %12 = vsyncpa [#allocation3 + $0x1], 0  ;;  %s928_s15 = smov 0   ;;  %s930_s16 = smov 0  }
   0x3   :  { %s932_s17 = smov 0   ;;  %s934_s18 = smov 0  }
   0x4 LB: > { %s949_s19 = sadd.s32 4294967295, %s900_s18   ;;  %s694_s20 = sadd.s32 4294967294, %s900_s18   ;;  %s900_s18 = sphi %s934_s18, %s1145_s18   ;;  %s896_s17 = sphi %s932_s17, %s1144_s17   ;;  %s892_s16 = sphi %s930_s16, %s1143_s16   ;;  %s888_s15 = sphi %s928_s15, %s1142_s15  }
   0x5   : > { %s953_s21 = sadd.s32 1, %s900_s18   ;;  %s119_s22 = sadd.s32 1, %s896_s17 }
   0x6   : > { %s116_s23 = ssub.s32 %s900_s18, %s953_s21  ;;  %p129_p0 = scmp.ne.s32.totalorder %s896_s17, %s892_s16 }
   0x7   : > { %p117_p1 = scmp.eq.s32.totalorder %s116_s23, 0  ;;  %p130_p2 = scmp.eq.s32.totalorder %s949_s19, 1 }
   0x8   : > { %p135_p3 = scmp.ne.s32.totalorder %s892_s16, %s888_s15  ;;  %p136_p4 = scmp.eq.s32.totalorder %s694_s20, 1 }
   0x9   : > { %s964_s24 = scalar_select %p117_p1, %s896_s17, %s119_s22  }
   0xa   : > { %p966_p5 = por %p130_p2, %p129_p0  ;;  %p970_p6 = por %p136_p4, %p135_p3 }
   0xb   : > { %p695_p7 = scmp.ge.s32.totalorder %s900_s18, 1  ;;  %p143_p8 = scmp.lt.s32.totalorder %s900_s18, 3 }
   0xc   : > { %p765_p9 = scmp.eq.s32.totalorder %s949_s19, 0  ;;  %s158_s29 = sshll.u32 %s1137_s2, 4  ;;  %s159_s29 = int_to_ptr.vmem [resolvable:$true] %s158_s29 }
   0xd   : > { %p144_p10 = pnand %p695_p7, %p143_p8  ;;  %s902_s30 = smov [#allocation2]  }
   0xf   : > { %p757_p11 = pneg %p144_p10  ;;  %188 = sbr.rel (%p144_p10) target bundleno = 345 (0x159), region = 36 }
  0x11   : > { %p758_p12 = pnand %p765_p9, %p757_p11 }
  0x13   : > { %760 = dma.vmem_to_smem (!%p758_p12), %s159_s29, 16, %s902_s30, [#allocation4]  }
  0x14   : > { %879 = dma.done.wait (%p765_p9), [#allocation4], 16  }
  0x15   : > { %881 = vsyncadd (%p765_p9), [#allocation4], 4294967280 }
  0x16   : > { %195 = sfence }
  0x17   : > { %s701_s5 = sshll.u32 %s949_s19, 5  ;;  %vm265_vm0 = vcmask 261120   ;;  %v264_v32 = vld [vmem:[%s1136_s1] sm:$0xff]  ;;  %s1056_s12 = sshll.u32 %s949_s19, 1  ;;  %vm590_vm15 = vcmask 1040384  }
  0x18   : > { %p221_p13 = scmp.lt.s32.totalorder %s701_s5, 63  ;;  %p227_p0 = scmp.lt.s32.totalorder %s1056_s12, 3 }
  0x19   : > { %s405_s23 = sld [smem:[#allocation2]]  ;;  %s217_s27 = sand.u32 1, %s892_s16  }
  0x1a   : > { %s1147_s5 = smov (!%p221_p13, %s701_s5), 63  ;;  %s738_s19 = sld [smem:[#allocation2 + $0x1]] }
  0x1b   : > { %s702_s6 = sshll.u32 %s1147_s5, 3  ;;  %s700_s28 = sshll.u32 %s217_s27, 1 }
  0x1c   : > { %s984_s9 = scalar_lea.vmem %s1135_s0, %s702_s6  ;;  %s609_s5 = scalar_lea.hbm %s1139_s4, %s1056_s12 }
  0x1d   : > { %v247_v0 = vld [vmem:[%s984_s9 + $0x78] sm:$0xff]  ;;  %v246_v2 = vld [vmem:[%s984_s9 + $0x70] sm:$0xff]  ;;  %v245_v4 = vld [vmem:[%s984_s9 + $0x68] sm:$0xff]  ;;  %s228_s13 = scalar_select %p227_p0, %s1056_s12, 3 }
  0x1e   : > { %v263_v1 = vld [vmem:[%s984_s9 + $0xf8] sm:$0xff]  ;;  %704 = vmatpush.xpose.msk.msra.mxu0 %vm265_vm0, %v247_v0  ;;  %v262_v3 = vld [vmem:[%s984_s9 + $0xf0] sm:$0xff]  ;;  %v261_v5 = vld [vmem:[%s984_s9 + $0xe8] sm:$0xff]  ;;  %s219_s6 = scalar_lea.vmem [#allocation5], %s700_s28  ;;  %s613_s8 = sshll.u32 %s609_s5, 4  ;;  %s614_s8 = int_to_ptr.hbm [resolvable:$true] %s613_s8 }
  0x1f   : > { %721 = vmatpush.xpose.msk.msra.mxu1 %vm265_vm0, %v263_v1  ;;  %v244_v6 = vld [vmem:[%s984_s9 + $0x60] sm:$0xff]  ;;  %v243_v8 = vld [vmem:[%s984_s9 + $0x58] sm:$0xff]  ;;  %v242_v10 = vld [vmem:[%s984_s9 + $0x50] sm:$0xff]  ;;  %s229_s22 = scalar_lea.vmem %s1138_s3, %s228_s13  ;;  %v406_v36 = vstv %s405_s23  ;;  %s611_s7 = sshll.u32 %s219_s6, 4  ;;  %s612_s7 = int_to_ptr.vmem [resolvable:$true] %s611_s7 }
  0x20   : > { %v260_v7 = vld [vmem:[%s984_s9 + $0xe0] sm:$0xff]  ;;  %v259_v9 = vld [vmem:[%s984_s9 + $0xd8] sm:$0xff]  ;;  %v258_v11 = vld [vmem:[%s984_s9 + $0xd0] sm:$0xff]  ;;  %v410_v49 = vstv %s738_s19  ;;  %s848_s10 = sshra.s32 %s614_s8, 4  ;;  %s854_s14 = scalar_lea.hbm %s1139_s4, 4  ;;  %s849_s10 = int_to_ptr.hbm [resolvable:$true] %s848_s10 }
  0x21   : > { %v241_v12 = vld [vmem:[%s984_s9 + $0x48] sm:$0xff]  ;;  %v240_v14 = vld [vmem:[%s984_s9 + $0x40] sm:$0xff]  ;;  %v239_v16 = vld [vmem:[%s984_s9 + $0x38] sm:$0xff]  ;;  %s850_s11 = scalar_lea.hbm %s849_s10, 2  ;;  %p855_p4 = scmp.lt.s32.totalorder %s849_s10, %s1139_s4 }
  0x22   : > { %705 = vmatpush.xpose.msk.msra.mxu0 %vm265_vm0, %v246_v2  ;;  %v257_v13 = vld [vmem:[%s984_s9 + $0xc8] sm:$0xff]  ;;  %v256_v15 = vld [vmem:[%s984_s9 + $0xc0] sm:$0xff]  ;;  %v255_v17 = vld [vmem:[%s984_s9 + $0xb8] sm:$0xff]  ;;  %p851_p1 = scmp.ne.s32.totalorder %s849_s10, %s850_s11  ;;  %p856_p7 = scmp.lt.s32.totalorder %s854_s14, %s850_s11 }
  0x23   : > { %722 = vmatpush.xpose.msk.msra.mxu1 %vm265_vm0, %v262_v3  ;;  %v238_v18 = vld [vmem:[%s984_s9 + $0x30] sm:$0xff]  ;;  %v237_v20 = vld [vmem:[%s984_s9 + $0x28] sm:$0xff]  ;;  %v236_v22 = vld [vmem:[%s984_s9 + $0x20] sm:$0xff] }
  0x24   : > { %v254_v19 = vld [vmem:[%s984_s9 + $0xb0] sm:$0xff]  ;;  %v253_v21 = vld [vmem:[%s984_s9 + $0xa8] sm:$0xff]  ;;  %v252_v23 = vld [vmem:[%s984_s9 + $0xa0] sm:$0xff]  ;;  %p852_p2 = pnand %p851_p1, %p966_p5  ;;  %p857_p8 = por %p856_p7, %p855_p4 }
  0x25   : > { %v235_v24 = vld [vmem:[%s984_s9 + $0x18] sm:$0xff]  ;;  %v234_v26 = vld [vmem:[%s984_s9 + $0x10] sm:$0xff]  ;;  %v233_v28 = vld [vmem:[%s984_s9 + $0x8] sm:$0xff] }
  0x26   : > { %706 = vmatpush.xpose.msk.msra.mxu0 %vm265_vm0, %v245_v4  ;;  %v251_v25 = vld [vmem:[%s984_s9 + $0x98] sm:$0xff]  ;;  %v250_v27 = vld [vmem:[%s984_s9 + $0x90] sm:$0xff]  ;;  %v249_v29 = vld [vmem:[%s984_s9 + $0x88] sm:$0xff]  ;;  %p853_p3 = pneg %p852_p2 }
  0x27   : > { %723 = vmatpush.xpose.msk.msra.mxu1 %vm265_vm0, %v261_v5  ;;  %v232_v30 = vld [vmem:[%s984_s9] sm:$0xff] }
  0x28   : > { %v248_v31 = vld [vmem:[%s984_s9 + $0x80] sm:$0xff]  ;;  %s599_s9 = scalar_lea.sflag [#allocation3], %s217_s27  ;;  %p858_p9 = pnand %p857_p8, %p853_p3 }
  0x29   : > { %v413_v33 = vld [vmem:[%s229_s22] sm:$0x3] }
  0x2a   : > { %707 = vmatpush.xpose.msk.msra.mxu0 %vm265_vm0, %v244_v6  ;;  %801 = vlog2.f32 %v413_v33 }
  0x2b   : > { %724 = vmatpush.xpose.msk.msra.mxu1 %vm265_vm0, %v260_v7 }
  0x2e   : > { %708 = vmatpush.xpose.msk.msra.mxu0 %vm265_vm0, %v243_v8 }
  0x2f   : > { %725 = vmatpush.xpose.msk.msra.mxu1 %vm265_vm0, %v259_v9 }
  0x30   : > { %v802_v34 = vpop.eup %801 }
  0x31   : > { %v417_v35 = vmul.f32 0.6931472, %v802_v34 }
  0x32   : > { %709 = vmatpush.xpose.msk.msra.mxu0 %vm265_vm0, %v242_v10 }
  0x33   : > { %726 = vmatpush.xpose.msk.msra.mxu1 %vm265_vm0, %v258_v11  ;;  %v419_v40 = vperm.slane %v417_v35, 0  ;;  %v420_v42 = vperm.slane %v417_v35, 1 }
  0x36   : > { %710 = vmatpush.xpose.msk.msra.mxu0 %vm265_vm0, %v241_v12 }
  0x37   : > { %727 = vmatpush.xpose.msk.msra.mxu1 %vm265_vm0, %v257_v13 }
  0x3a   : > { %711 = vmatpush.xpose.msk.msra.mxu0 %vm265_vm0, %v240_v14 }
  0x3b   : > { %728 = vmatpush.xpose.msk.msra.mxu1 %vm265_vm0, %v256_v15 }
  0x3e   : > { %712 = vmatpush.xpose.msk.msra.mxu0 %vm265_vm0, %v239_v16 }
  0x3f   : > { %729 = vmatpush.xpose.msk.msra.mxu1 %vm265_vm0, %v255_v17 }
  0x42   : > { %713 = vmatpush.xpose.msk.msra.mxu0 %vm265_vm0, %v238_v18 }
  0x43   : > { %730 = vmatpush.xpose.msk.msra.mxu1 %vm265_vm0, %v254_v19 }
  0x46   : > { %714 = vmatpush.xpose.msk.msra.mxu0 %vm265_vm0, %v237_v20 }
  0x47   : > { %731 = vmatpush.xpose.msk.msra.mxu1 %vm265_vm0, %v253_v21 }
  0x4a   : > { %715 = vmatpush.xpose.msk.msra.mxu0 %vm265_vm0, %v236_v22 }
  0x4b   : > { %732 = vmatpush.xpose.msk.msra.mxu1 %vm265_vm0, %v252_v23 }
  0x4e   : > { %716 = vmatpush.xpose.msk.msra.mxu0 %vm265_vm0, %v235_v24 }
  0x4f   : > { %733 = vmatpush.xpose.msk.msra.mxu1 %vm265_vm0, %v251_v25 }
  0x52   : > { %717 = vmatpush.xpose.msk.msra.mxu0 %vm265_vm0, %v234_v26 }
  0x53   : > { %734 = vmatpush.xpose.msk.msra.mxu1 %vm265_vm0, %v250_v27 }
  0x56   : > { %718 = vmatpush.xpose.msk.msra.mxu0 %vm265_vm0, %v233_v28 }
  0x57   : > { %735 = vmatpush.xpose.msk.msra.mxu1 %vm265_vm0, %v249_v29 }
  0x5a   : > { %719 = vmatpush.xpose.msk.msra.mxu0 %vm265_vm0, %v232_v30 }
  0x5b   : > { %736 = vmatpush.xpose.msk.msra.mxu1 %vm265_vm0, %v248_v31 }
  0x5d   : > { %720 = vmatmul.msk.f32.vlgmr.msra.gmra.mxu0 %vm265_vm0, %v264_v32 }
  0x5e   : > { %737 = vmatmul.msk.f32.vlgmr.msra.gmra.mxu1 %vm265_vm0, %v264_v32 }
  0xda   : > { %v382_v37 = vpop.f32.mrf.mxu0 }
  0xdb   : > { %v402_v38 = vpop.f32.mrf.mxu1  ;;  %v407_v39 = vadd.f32 %v406_v36, %v382_v37  ;;  %v411_v50 = vadd.f32 %v410_v49, %v382_v37 }
  0xdc   : > { %v408_v41 = vadd.f32 %v406_v36, %v402_v38  ;;  %v412_v51 = vadd.f32 %v410_v49, %v402_v38 }
  0xdd   : > { %v739_v43 = vadd.f32 -1.0, %v407_v39  ;;  %v433_v55 = vrot.slane %v411_v50, 1 }
  0xde   : > { %v740_v44 = vadd.f32 -1.0, %v408_v41  ;;  %v434_v57 = vrot.slane %v412_v51, 1 }
  0xdf   : > { %v423_v45 = vmul.f32 %v739_v43, %v419_v40 }
  0xe0   : > { %v424_v46 = vmul.f32 %v740_v44, %v420_v42 }
  0xe1   : > { %v425_v47 = vmul.f32 1.442695, %v423_v45 }
  0xe2   : > { %v427_v48 = vmul.f32 1.442695, %v424_v46 }
  0xe3   : > { %803 = vpow2.f32 %v425_v47 }
  0xe4   : > { %805 = vpow2.f32 %v427_v48 }
  0xe9   : > { %v804_v52 = vpop.eup %803 }
  0xea   : > { %v806_v53 = vpop.eup %805  ;;  %v429_v54 = vmul.f32 %v804_v52, %v407_v39 }
  0xeb   : > { %v430_v56 = vmul.f32 %v806_v53, %v408_v41 }
  0xec   : > { %v437_v58 = vadd.f32 %v433_v55, %v429_v54 }
  0xed   : > { %v438_v59 = vadd.f32 %v434_v57, %v430_v56 }
  0xee   : > { %807 = vrcp.f32 %v437_v58  ;;  %v450_v1 = vand.u32 2147483648, %v437_v58  ;;  %v448_v4 = vand.u32 2147483647, %v437_v58  ;;  %vm444_vm3 = vweird.f32 %v437_v58 }
  0xef   : > { %809 = vrcp.f32 %v438_v59  ;;  %v465_v5 = vand.u32 2147483648, %v438_v59  ;;  %v463_v7 = vand.u32 2147483647, %v438_v59  ;;  %vm459_vm5 = vweird.f32 %v438_v59 }
  0xf0   : > { %v451_v9 = vor.u32 1.1754944e-38, %v450_v1  ;;  %vm449_vm6 = vcmp.eq.f32.partialorder %v448_v4, 8.507059e+37 }
  0xf1   : > { %v466_v12 = vor.u32 1.1754944e-38, %v465_v5  ;;  %vm464_vm8 = vcmp.eq.f32.partialorder %v463_v7, 8.507059e+37 }
  0xf4   : > { %v808_v60 = vpop.eup %807 }
  0xf5   : > { %v810_v61 = vpop.eup %809  ;;  %v440_v62 = vmul.f32 %v808_v60, %v437_v58  ;;  %vm445_vm1 = vweird.f32 %v808_v60 }
  0xf6   : > { %v455_v63 = vmul.f32 %v810_v61, %v438_v59  ;;  %vm460_vm2 = vweird.f32 %v810_v61  ;;  %vm446_vm4 = vmor %vm444_vm3, %vm445_vm1 }
  0xf7   : > { %v441_v0 = vsub.f32 1.0, %v440_v62  ;;  %vm461_vm7 = vmor %vm459_vm5, %vm460_vm2 }
  0xf8   : > { %v456_v2 = vsub.f32 1.0, %v455_v63 }
  0xf9   : > { %v442_v3 = vmul.f32 %v808_v60, %v441_v0 }
  0xfa   : > { %v457_v6 = vmul.f32 %v810_v61, %v456_v2 }
  0xfb   : > { %v443_v8 = vadd.f32 %v808_v60, %v442_v3 }
  0xfc   : > { %v458_v10 = vadd.f32 %v810_v61, %v457_v6 }
  0xfd   : > { %v447_v11 = vsel %vm446_vm4, %v808_v60, %v443_v8 }
  0xfe   : > { %v452_v13 = vsel %vm449_vm6, %v451_v9, %v447_v11  ;;  %v462_v14 = vsel %vm461_vm7, %v810_v61, %v458_v10 }
  0xff   : > { %v453_v15 = vmul.f32 %v452_v13, %v429_v54  ;;  %v467_v16 = vsel %vm464_vm8, %v466_v12, %v462_v14 }
 0x100   : > { %v468_v17 = vmul.f32 %v467_v16, %v430_v56 }
 0x101   : > { %v469_v18 = vmul.f32 2.0, %v453_v15 }
 0x102   : > { %v470_v19 = vmul.f32 2.0, %v468_v17 }
 0x103   : > { %v1063_v20 = vadd.f32 -1.0, %v469_v18 }
 0x104   : > { %v1065_v21 = vadd.f32 -1.0, %v470_v19 }
 0x105   : > { %v473_v22 = vsub.f32 1.0, %v1063_v20  ;;  %v475_v23 = vadd.f32 1.0, %v1063_v20 }
 0x106   : > { %v474_v24 = vsub.f32 1.0, %v1065_v21  ;;  %v476_v25 = vadd.f32 1.0, %v1065_v21 }
 0x107   : > { %v477_v26 = vmul.f32 %v475_v23, %v473_v22 }
 0x108   : > { %v478_v27 = vmul.f32 %v476_v25, %v474_v24 }
 0x109   : > { %811 = vlog2.f32 %v477_v26 }
 0x10a   : > { %813 = vlog2.f32 %v478_v27 }
 0x10f   : > { %v812_v28 = vpop.eup %811 }
 0x110   : > { %v814_v29 = vpop.eup %813  ;;  %v480_v30 = vmul.f32 0.6931472, %v812_v28 }
 0x111   : > { %v482_v31 = vmul.f32 0.6931472, %v814_v29 }
 0x112   : > { %v1071_v32 = vsub.f32 0.0, %v480_v30 }
 0x113   : > { %v1073_v33 = vsub.f32 0.0, %v482_v31 }
 0x114   : > { %v1076_v34 = vadd.f32 -2.5, %v1071_v32  ;;  %v519_v35 = vmax.f32 %v1071_v32, 5.0  ;;  %vm579_vm13 = vcmp.lt.f32.partialorder %v1071_v32, 5.0 }
 0x115   : > { %v1080_v36 = vadd.f32 -2.5, %v1073_v33  ;;  %v520_v37 = vmax.f32 %v1073_v33, 5.0  ;;  %vm580_vm14 = vcmp.lt.f32.partialorder %v1073_v33, 5.0 }
 0x116   : > { %v487_v38 = vmul.f32 2.8102264e-08, %v1076_v34  ;;  %815 = vrsqrt.f32 %v519_v35  ;;  %vm528_vm9 = vcmp.eq.f32.partialorder %v519_v35, inf  ;;  %v531_v0 = vand.u32 2147483648, %v519_v35 }
 0x117   : > { %v488_v39 = vmul.f32 2.8102264e-08, %v1080_v36  ;;  %817 = vrsqrt.f32 %v520_v37  ;;  %vm530_vm10 = vcmp.eq.f32.partialorder %v519_v35, 0.0  ;;  %vm540_vm11 = vcmp.eq.f32.partialorder %v520_v37, inf }
 0x118   : > { %v489_v40 = vadd.f32 3.4327394e-07, %v487_v38  ;;  %v543_v4 = vand.u32 2147483648, %v520_v37  ;;  %vm542_vm12 = vcmp.eq.f32.partialorder %v520_v37, 0.0 }
 0x119   : > { %v490_v41 = vadd.f32 3.4327394e-07, %v488_v39 }
 0x11a   : > { %v491_v42 = vmul.f32 %v1076_v34, %v489_v40 }
 0x11b   : > { %v492_v43 = vmul.f32 %v1080_v36, %v490_v41 }
 0x11c   : > { %v816_v44 = vpop.eup %815  ;;  %v493_v45 = vadd.f32 -3.5233877e-06, %v491_v42 }
 0x11d   : > { %v818_v46 = vpop.eup %817  ;;  %v522_v47 = vmul.f32 %v816_v44, %v519_v35  ;;  %v494_v48 = vadd.f32 -3.5233877e-06, %v492_v43 }
 0x11e   : > { %v534_v49 = vmul.f32 %v818_v46, %v520_v37  ;;  %v495_v50 = vmul.f32 %v1076_v34, %v493_v45 }
 0x11f   : > { %v523_v51 = vmul.f32 %v816_v44, %v522_v47  ;;  %v496_v52 = vmul.f32 %v1080_v36, %v494_v48 }
 0x120   : > { %v535_v53 = vmul.f32 %v818_v46, %v534_v49  ;;  %v497_v56 = vadd.f32 -4.3915065e-06, %v495_v50 }
 0x121   : > { %v524_v54 = vmul.f32 0.5, %v523_v51  ;;  %v498_v58 = vadd.f32 -4.3915065e-06, %v496_v52 }
 0x122   : > { %v536_v55 = vmul.f32 0.5, %v535_v53  ;;  %v499_v62 = vmul.f32 %v1076_v34, %v497_v56 }
 0x123   : > { %v525_v57 = vsub.f32 1.5, %v524_v54  ;;  %v500_v1 = vmul.f32 %v1080_v36, %v498_v58 }
 0x124   : > { %v537_v59 = vsub.f32 1.5, %v536_v55  ;;  %v501_v7 = vadd.f32 0.00021858087, %v499_v62 }
 0x125   : > { %v526_v60 = vmul.f32 %v816_v44, %v525_v57  ;;  %v502_v10 = vadd.f32 0.00021858087, %v500_v1 }
 0x126   : > { %v538_v61 = vmul.f32 %v818_v46, %v537_v59  ;;  %v503_v14 = vmul.f32 %v1076_v34, %v501_v7 }
 0x127   : > { %v527_v63 = vmul.f32 %v526_v60, %v519_v35  ;;  %v504_v16 = vmul.f32 %v1080_v36, %v502_v10 }
 0x128   : > { %v539_v2 = vmul.f32 %v538_v61, %v520_v37  ;;  %v505_v22 = vadd.f32 -0.001253725, %v503_v14 }
 0x129   : > { %v529_v3 = vsel %vm528_vm9, %v519_v35, %v527_v63  ;;  %v506_v24 = vadd.f32 -0.001253725, %v504_v16 }
 0x12a   : > { %v532_v5 = vsel %vm530_vm10, %v531_v0, %v529_v3  ;;  %v541_v6 = vsel %vm540_vm11, %v520_v37, %v539_v2  ;;  %v507_v28 = vmul.f32 %v1076_v34, %v505_v22 }
 0x12b   : > { %v745_v8 = vadd.f32 -3.0, %v532_v5  ;;  %v544_v9 = vsel %vm542_vm12, %v543_v4, %v541_v6  ;;  %v508_v30 = vmul.f32 %v1080_v36, %v506_v24  ;;  %v593_v4 = vlaneseq }
 0x12c   : > { %v746_v11 = vadd.f32 -3.0, %v544_v9  ;;  %v509_v38 = vadd.f32 -0.0041776816, %v507_v28 }
 0x12d   : > { %v547_v12 = vmul.f32 -0.00020021426, %v745_v8  ;;  %v510_v40 = vadd.f32 -0.0041776816, %v508_v30  ;;  %vm595_vm0 = vcmp.lt.s32.totalorder %v593_v4, 256 }
 0x12e   : > { %v548_v13 = vmul.f32 -0.00020021426, %v746_v11  ;;  %v511_v44 = vmul.f32 %v1076_v34, %v509_v38 }
 0x12f   : > { %v549_v15 = vadd.f32 0.00010095056, %v547_v12  ;;  %v512_v46 = vmul.f32 %v1080_v36, %v510_v40 }
 0x130   : > { %v550_v17 = vadd.f32 0.00010095056, %v548_v13  ;;  %v513_v50 = vadd.f32 0.24664073, %v511_v44 }
 0x131   : > { %v551_v18 = vmul.f32 %v745_v8, %v549_v15  ;;  %v514_v52 = vadd.f32 0.24664073, %v512_v46 }
 0x132   : > { %v552_v19 = vmul.f32 %v746_v11, %v550_v17  ;;  %v515_v56 = vmul.f32 %v1076_v34, %v513_v50 }
 0x133   : > { %v553_v23 = vadd.f32 0.0013493432, %v551_v18  ;;  %v516_v58 = vmul.f32 %v1080_v36, %v514_v52 }
 0x134   : > { %v554_v25 = vadd.f32 0.0013493432, %v552_v19  ;;  %v517_v62 = vadd.f32 1.5014094, %v515_v56 }
 0x135   : > { %v555_v26 = vmul.f32 %v745_v8, %v553_v23  ;;  %v518_v0 = vadd.f32 1.5014094, %v516_v58 }
 0x136   : > { %v556_v27 = vmul.f32 %v746_v11, %v554_v25 }
 0x137   : > { %v557_v29 = vadd.f32 -0.0036734284, %v555_v26 }
 0x138   : > { %v558_v31 = vadd.f32 -0.0036734284, %v556_v27 }
 0x139   : > { %v559_v35 = vmul.f32 %v745_v8, %v557_v29 }
 0x13a   : > { %v560_v37 = vmul.f32 %v746_v11, %v558_v31 }
 0x13b   : > { %v561_v39 = vadd.f32 0.0057395077, %v559_v35 }
 0x13c   : > { %v562_v41 = vadd.f32 0.0057395077, %v560_v37 }
 0x13d   : > { %v563_v42 = vmul.f32 %v745_v8, %v561_v39 }
 0x13e   : > { %v564_v43 = vmul.f32 %v746_v11, %v562_v41 }
 0x13f   : > { %v565_v45 = vadd.f32 -0.0076224613, %v563_v42 }
 0x140   : > { %v566_v47 = vadd.f32 -0.0076224613, %v564_v43 }
 0x141   : > { %v567_v48 = vmul.f32 %v745_v8, %v565_v45 }
 0x142   : > { %v568_v49 = vmul.f32 %v746_v11, %v566_v47 }
 0x143   : > { %v569_v51 = vadd.f32 0.0094388705, %v567_v48 }
 0x144   : > { %v570_v53 = vadd.f32 0.0094388705, %v568_v49 }
 0x145   : > { %v571_v54 = vmul.f32 %v745_v8, %v569_v51 }
 0x146   : > { %v572_v55 = vmul.f32 %v746_v11, %v570_v53 }
 0x147   : > { %v573_v57 = vadd.f32 1.001674, %v571_v54 }
 0x148   : > { %v574_v59 = vadd.f32 1.001674, %v572_v55 }
 0x149   : > { %v575_v60 = vmul.f32 %v745_v8, %v573_v57 }
 0x14a   : > { %v576_v61 = vmul.f32 %v746_v11, %v574_v59 }
 0x14b   : > { %v577_v63 = vadd.f32 2.8329768, %v575_v60 }
 0x14c   : > { %v578_v1 = vadd.f32 2.8329768, %v576_v61 }
 0x14d   : > { %v581_v2 = vsel %vm579_vm13, %v517_v62, %v577_v63 }
 0x14e   : > { %v582_v3 = vsel %vm580_vm14, %v518_v0, %v578_v1  ;;  %v583_v34 = vmul.f32 %v1063_v20, %v581_v2 }
 0x14f   : > { %v584_v36 = vmul.f32 %v1065_v21, %v582_v3 }
 0x150   : > { %v585_v32 = vmul.f32 1.4142135, %v583_v34 }
 0x151   : > { %v586_v5 = vmul.f32 1.4142135, %v584_v36 }
 0x153   : > { %v589_v6 = vrot.slane %v586_v5, 7 }
 0x155   : > { %v591_v33 = vsel %vm590_vm15, %v585_v32, %v589_v6 }
 0x156   : > { %597 = vst.msk [vmem:[%s219_s6] sm:$0x3] %vm595_vm0, %v591_v33 }
 0x157   : > { %861 = shalt.err (!%p858_p9)
}
 0x158   : > { %755 = dma.vmem_to_hbm [thread:$0]  (%p966_p5), %s612_s7, 32, %s614_s8, %s599_s9  }
 0x159 PF: > { %p767_p10 = scmp.ge.s32.totalorder %s900_s18, 2  ;;  %s625_s23 = sand.u32 1, %s888_s15  }
 0x15a   : > { %s626_s19 = scalar_lea.sflag [#allocation3], %s625_s23 }
 0x15b   : > { %p762_p11 = pnand %p767_p10, %p970_p6 }
 0x15d   : > { %p763_p12 = pneg %p762_p11 }
 0x15f   : > { %883 = dma.done.wait (%p763_p12), %s626_s19, 32  }
 0x160   : > { %885 = vsyncadd (%p763_p12), %s626_s19, 4294967264  ;;  %p15_p13 = scmp.ge.s32.totalorder %s953_s21, 4   ;;  %s1142_s15 = smov %s892_s16 }
 0x161   : > { %s1143_s16 = smov %s896_s17  ;;  %s1144_s17 = smov %s964_s24 }
 0x162   : > { %s1145_s18 = smov %s953_s21  ;;  %17 = sbr.rel (!%p15_p13) target bundleno = 4 (0x4), region = 79 }
 0x167   :  { %632 = vsyncpa [#allocation3], 1 }
 0x168   :  { %634 = vsyncpa [#allocation3 + $0x1], 1 }
 0x169   :  { %635 = vsyncpa [#allocation4], 1 }
 0x16a   :  { %637 = vsyncpa [#allocation4 + $0x1], 1 }

</bundles_post_ra>
